<compile_context>
chip_gen: v6e
topology: v6e:2x2x1
jax: 0.10.0
libtpu: 0.0.40
codegen_flags: <defaults>
</compile_context>

<pallas_src>
import jax
import jax.numpy as jnp
import numpy as np
from jax.experimental import pallas as pl
from jax.experimental.pallas import tpu as pltpu

LANE = 128               # TPU lane width; hidden dims padded to this
H1, H2, H3 = 40, 20, 1   # real layer widths from the PyTorch module


def _round_up(n, m):
  return ((n + m - 1) // m) * m


def _pad_to(x, shape):
  pads = [(0, t - s) for s, t in zip(x.shape, shape)]
  return jnp.pad(x, pads)


# --------------------------------------------------------------------------- #
# Fused 3-layer MLP kernel (one batch tile per grid step):                     #
#   h1 = relu(x @ W1 + b1)   (MXU, bf16 in / f32 acc)                          #
#   h2 = relu(h1 @ W2 + b2)  (MXU, bf16 in / f32 acc)                          #
#   y  = sum(h2 * w3_row) + b3   (VPU mul + XLU lane reduce -> (TM, 1))        #
# --------------------------------------------------------------------------- #
def make_regression_dnn(b_pad, d, tm, x_dtype, out_dtype):
  def kernel(x_ref, w1_ref, b1_ref, w2_ref, b2_ref, w3_ref, b3_ref, o_ref):
    x = x_ref[...]                                              # (TM, D) bf16
    h = jnp.dot(x, w1_ref[...], preferred_element_type=jnp.float32)
    h = jnp.maximum(h + b1_ref[...], 0.0)                       # (TM, 128) f32
    h = jnp.dot(h.astype(w2_ref.dtype), w2_ref[...],
                preferred_element_type=jnp.float32)
    h = jnp.maximum(h + b2_ref[...], 0.0)                       # (TM, 128) f32
    # fc3 (20 -> 1): VPU multiply + lane reduction, compact (TM, 1) result.
    y = jnp.sum(h * w3_ref[...], axis=-1, keepdims=True) + b3_ref[...]
    o_ref[...] = y.astype(o_ref.dtype)                          # (TM, 1)

  resident = lambda shape: pl.BlockSpec(shape, lambda i: (0, 0))

  return pl.pallas_call(
      kernel,
      out_shape=jax.ShapeDtypeStruct((b_pad, 1), out_dtype),
      grid=(b_pad // tm,),
      in_specs=[
          pl.BlockSpec((tm, d), lambda i: (i, 0)),          # x tile (streamed)
          resident((d, LANE)), resident((1, LANE)),          # fc1 W / b
          resident((LANE, LANE)), resident((1, LANE)),       # fc2 W / b
          resident((1, LANE)), resident((1, 1)),             # fc3 row W / b
      ],
      out_specs=pl.BlockSpec((tm, 1), lambda i: (i, 0)),
      compiler_params=pltpu.CompilerParams(
          dimension_semantics=("parallel",)),
  )


# --------------------------------------------------------------------------- #
# One-time parameter prep: PyTorch (out, in) layout -> (in, out), lane-padded, #
# bf16 storage for the two MXU weights, f32 for biases and the tiny fc3 row.   #
# Padded hidden units compute relu(0) = 0 and feed zero weights downstream, so #
# the real output is exact w.r.t. the bf16-rounded weights.                    #
# --------------------------------------------------------------------------- #
def prepare_params(params, input_dim):
  bf16 = jnp.bfloat16
  f32 = jnp.float32
  w1 = _pad_to(params['fc1_w'].T.astype(bf16), (input_dim, LANE))   # (D, 128)
  b1 = _pad_to(params['fc1_b'].astype(f32)[None, :], (1, LANE))
  w2 = _pad_to(params['fc2_w'].T.astype(bf16), (LANE, LANE))        # (128, 128)
  b2 = _pad_to(params['fc2_b'].astype(f32)[None, :], (1, LANE))
  w3 = _pad_to(params['fc3_w'].astype(f32).reshape(1, H2), (1, LANE))  # (1, 128)
  b3 = params['fc3_b'].astype(f32).reshape(1, 1)                       # (1, 1)
  return (w1, b1, w2, b2, w3, b3)


def regression_dnn_pallas(prepped, x):
  B, D = x.shape
  tm = 256 if B >= 256 else _round_up(max(B, 8), 8)   # >= 8 sublanes per tile
  b_pad = _round_up(B, tm)
  xb = x.astype(jnp.bfloat16)
  if b_pad != B:
    xb = jnp.pad(xb, ((0, b_pad - B), (0, 0)))
  y = make_regression_dnn(b_pad, D, tm, xb.dtype, jnp.float32)(xb, *prepped)
  return y[:B, 0]                                     # == squeeze(1)


# --------------------------------------------------------------------------- #
# Deterministic synthetic params (PyTorch Linear layouts: (out, in) / (out,))  #
# --------------------------------------------------------------------------- #
def init_params(key, input_dim):
  ks = jax.random.split(key, 6)
  u = lambda k, shape, fan_in: jax.random.uniform(
      k, shape, jnp.float32, -1.0 / np.sqrt(fan_in), 1.0 / np.sqrt(fan_in))
  return {
      'fc1_w': u(ks[0], (H1, input_dim), input_dim),
      'fc1_b': u(ks[1], (H1,), input_dim),
      'fc2_w': u(ks[2], (H2, H1), H1),
      'fc2_b': u(ks[3], (H2,), H1),
      'fc3_w': u(ks[4], (H3, H2), H2),
      'fc3_b': u(ks[5], (H3,), H2),
  }


# --------------------------------------------------------------------------- #
# Plain-JAX references.                                                        #
#  - regression_dnn_ref: exact PyTorch math in f32 (dropout = eval-mode id).   #
#  - regression_dnn_ref_bf16: same math with the kernel's bf16-storage /       #
#    f32-accumulation choices, used for the tight numerical check.             #
# --------------------------------------------------------------------------- #
def regression_dnn_ref(params, x):
  relu = lambda v: jnp.maximum(v, 0.0)
  h = relu(x @ params['fc1_w'].T + params['fc1_b'])
  h = relu(h @ params['fc2_w'].T + params['fc2_b'])
  y = h @ params['fc3_w'].T + params['fc3_b']
  return y[:, 0]


def regression_dnn_ref_bf16(params, x):
  bf16 = jnp.bfloat16
  relu = lambda v: jnp.maximum(v, 0.0)
  h = jnp.dot(x.astype(bf16), params['fc1_w'].T.astype(bf16),
              preferred_element_type=jnp.float32)
  h = relu(h + params['fc1_b'])
  h = jnp.dot(h.astype(bf16), params['fc2_w'].T.astype(bf16),
              preferred_element_type=jnp.float32)
  h = relu(h + params['fc2_b'])
  y = h @ params['fc3_w'].T.astype(jnp.float32) + params['fc3_b']
  return y[:, 0]


if __name__ == "__main__":
  B, input_dim = 2, 32

  key = jax.random.PRNGKey(0)
  pkey, xkey = jax.random.split(key)
  params = init_params(pkey, input_dim)
  x = jax.random.normal(xkey, (B, input_dim), dtype=jnp.float32)

  prepped = prepare_params(params, input_dim)          # one-time param prep
  fwd = jax.jit(regression_dnn_pallas)

  out = jax.block_until_ready(fwd(prepped, x))
  assert out.shape == (B,), out.shape

  # Tight check against a reference using identical bf16-storage / f32-acc math.
  ref_bf16 = regression_dnn_ref_bf16(params, x)
  np.testing.assert_allclose(np.asarray(out), np.asarray(ref_bf16),
                             rtol=1e-4, atol=1e-4)
  # Sanity against the pure-f32 PyTorch math (difference is only bf16 weight
  # rounding, not kernel structure).
  ref_f32 = regression_dnn_ref(params, x)
  np.testing.assert_allclose(np.asarray(out), np.asarray(ref_f32),
                             rtol=1e-1, atol=1e-1)
  print("KERNEL_OK")
</pallas_src>

<mosaic_0001>
module attributes {stable_mosaic.version = 11 : i64} {
  func.func @kernel(%arg0: i32, %arg1: memref<8x32xbf16, #tpu.memory_space<vmem>>, %arg2: memref<32x128xbf16, #tpu.memory_space<vmem>>, %arg3: memref<1x128xf32, #tpu.memory_space<vmem>>, %arg4: memref<128x128xbf16, #tpu.memory_space<vmem>>, %arg5: memref<1x128xf32, #tpu.memory_space<vmem>>, %arg6: memref<1x128xf32, #tpu.memory_space<vmem>>, %arg7: memref<1x1xf32, #tpu.memory_space<vmem>>, %arg8: memref<8x1xf32, #tpu.memory_space<vmem>>) attributes {dimension_semantics = [#tpu.dimension_semantics<parallel>], iteration_bounds = array<i64: 1>, scalar_prefetch = 0 : i64, scratch_operands = 0 : i64, tpu.core_type = #tpu.core_type<tc>, window_params = [{transform_indices = @transform_0, window_bounds = array<i64: 8, 32>}, {pipeline_mode = #tpu.pipeline_mode<synchronous>, transform_indices = @transform_1, window_bounds = array<i64: 32, 128>}, {pipeline_mode = #tpu.pipeline_mode<synchronous>, transform_indices = @transform_2, window_bounds = array<i64: 1, 128>}, {pipeline_mode = #tpu.pipeline_mode<synchronous>, transform_indices = @transform_3, window_bounds = array<i64: 128, 128>}, {pipeline_mode = #tpu.pipeline_mode<synchronous>, transform_indices = @transform_4, window_bounds = array<i64: 1, 128>}, {pipeline_mode = #tpu.pipeline_mode<synchronous>, transform_indices = @transform_5, window_bounds = array<i64: 1, 128>}, {pipeline_mode = #tpu.pipeline_mode<synchronous>, transform_indices = @transform_6, window_bounds = array<i64: 1, 1>}, {transform_indices = @transform_7, window_bounds = array<i64: 8, 1>}]} {
    %c0 = arith.constant 0 : index
    %c0_0 = arith.constant 0 : index
    %0 = vector.load %arg1[%c0, %c0_0] : memref<8x32xbf16, #tpu.memory_space<vmem>>, vector<8x32xbf16>
    %c0_1 = arith.constant 0 : index
    %c0_2 = arith.constant 0 : index
    %1 = vector.load %arg2[%c0_1, %c0_2] : memref<32x128xbf16, #tpu.memory_space<vmem>>, vector<32x128xbf16>
    %cst = arith.constant dense<0.000000e+00> : vector<8x128xf32>
    %2 = tpu.matmul %0, %1, %cst {dimension_numbers = #tpu.dot_dimension_numbers<[1], [0], [0], [1], [0, 0, 1, 1], [], []>} : vector<8x32xbf16>, vector<32x128xbf16>, vector<8x128xf32> -> vector<8x128xf32>
    %c0_3 = arith.constant 0 : index
    %c0_4 = arith.constant 0 : index
    %3 = vector.load %arg3[%c0_3, %c0_4] : memref<1x128xf32, #tpu.memory_space<vmem>>, vector<1x128xf32>
    %4 = vector.broadcast %3 : vector<1x128xf32> to vector<8x128xf32>
    %5 = arith.addf %2, %4 : vector<8x128xf32>
    %cst_5 = arith.constant 0.000000e+00 : f32
    %6 = vector.broadcast %cst_5 : f32 to vector<8x128xf32>
    %7 = arith.maximumf %5, %6 : vector<8x128xf32>
    %8 = arith.truncf %7 : vector<8x128xf32> to vector<8x128xbf16>
    %c0_6 = arith.constant 0 : index
    %c0_7 = arith.constant 0 : index
    %9 = vector.load %arg4[%c0_6, %c0_7] : memref<128x128xbf16, #tpu.memory_space<vmem>>, vector<128x128xbf16>
    %cst_8 = arith.constant dense<0.000000e+00> : vector<8x128xf32>
    %10 = tpu.matmul %8, %9, %cst_8 {dimension_numbers = #tpu.dot_dimension_numbers<[1], [0], [0], [1], [0, 0, 1, 1], [], []>} : vector<8x128xbf16>, vector<128x128xbf16>, vector<8x128xf32> -> vector<8x128xf32>
    %c0_9 = arith.constant 0 : index
    %c0_10 = arith.constant 0 : index
    %11 = vector.load %arg5[%c0_9, %c0_10] : memref<1x128xf32, #tpu.memory_space<vmem>>, vector<1x128xf32>
    %12 = vector.broadcast %11 : vector<1x128xf32> to vector<8x128xf32>
    %13 = arith.addf %10, %12 : vector<8x128xf32>
    %cst_11 = arith.constant 0.000000e+00 : f32
    %14 = vector.broadcast %cst_11 : f32 to vector<8x128xf32>
    %15 = arith.maximumf %13, %14 : vector<8x128xf32>
    %c0_12 = arith.constant 0 : index
    %c0_13 = arith.constant 0 : index
    %16 = vector.load %arg6[%c0_12, %c0_13] : memref<1x128xf32, #tpu.memory_space<vmem>>, vector<1x128xf32>
    %17 = vector.broadcast %16 : vector<1x128xf32> to vector<8x128xf32>
    %18 = arith.mulf %15, %17 : vector<8x128xf32>
    %cst_14 = arith.constant dense<0.000000e+00> : vector<8xf32>
    %19 = vector.multi_reduction <add>, %18, %cst_14 [1] : vector<8x128xf32> to vector<8xf32>
    %20 = vector.shape_cast %19 : vector<8xf32> to vector<8x1xf32>
    %c0_15 = arith.constant 0 : index
    %c0_16 = arith.constant 0 : index
    %21 = vector.load %arg7[%c0_15, %c0_16] : memref<1x1xf32, #tpu.memory_space<vmem>>, vector<1x1xf32>
    %22 = vector.broadcast %21 : vector<1x1xf32> to vector<8x1xf32>
    %23 = arith.addf %20, %22 : vector<8x1xf32>
    %c0_17 = arith.constant 0 : index
    %c0_18 = arith.constant 0 : index
    %24 = vector.load %arg8[%c0_17, %c0_18] : memref<8x1xf32, #tpu.memory_space<vmem>>, vector<8x1xf32>
    tpu.vector_store %arg8[%c0_17, %c0_18], %23 {strides = array<i32>} : memref<8x1xf32, #tpu.memory_space<vmem>>, vector<8x1xf32>,
    return
  }
  func.func @transform_0(%arg0: i32) -> (i32, i32) {
    %c0_i32 = arith.constant 0 : i32
    %c0_i32_0 = arith.constant 0 : i32
    return %arg0, %c0_i32 : i32, i32
  }
  func.func @transform_1(%arg0: i32) -> (i32, i32) {
    %c0_i32 = arith.constant 0 : i32
    %c0_i32_0 = arith.constant 0 : i32
    %c0_i32_1 = arith.constant 0 : i32
    return %c0_i32, %c0_i32_0 : i32, i32
  }
  func.func @transform_2(%arg0: i32) -> (i32, i32) {
    %c0_i32 = arith.constant 0 : i32
    %c0_i32_0 = arith.constant 0 : i32
    %c0_i32_1 = arith.constant 0 : i32
    return %c0_i32, %c0_i32_0 : i32, i32
  }
  func.func @transform_3(%arg0: i32) -> (i32, i32) {
    %c0_i32 = arith.constant 0 : i32
    %c0_i32_0 = arith.constant 0 : i32
    %c0_i32_1 = arith.constant 0 : i32
    return %c0_i32, %c0_i32_0 : i32, i32
  }
  func.func @transform_4(%arg0: i32) -> (i32, i32) {
    %c0_i32 = arith.constant 0 : i32
    %c0_i32_0 = arith.constant 0 : i32
    %c0_i32_1 = arith.constant 0 : i32
    return %c0_i32, %c0_i32_0 : i32, i32
  }
  func.func @transform_5(%arg0: i32) -> (i32, i32) {
    %c0_i32 = arith.constant 0 : i32
    %c0_i32_0 = arith.constant 0 : i32
    %c0_i32_1 = arith.constant 0 : i32
    return %c0_i32, %c0_i32_0 : i32, i32
  }
  func.func @transform_6(%arg0: i32) -> (i32, i32) {
    %c0_i32 = arith.constant 0 : i32
    %c0_i32_0 = arith.constant 0 : i32
    %c0_i32_1 = arith.constant 0 : i32
    return %c0_i32, %c0_i32_0 : i32, i32
  }
  func.func @transform_7(%arg0: i32) -> (i32, i32) {
    %c0_i32 = arith.constant 0 : i32
    %c0_i32_0 = arith.constant 0 : i32
    return %arg0, %c0_i32 : i32, i32
  }
}

</mosaic_0001>

<bundles_post_ra>
// kernel: regression_dnn_pallas.1
= control target key start
LH: loop header
LB: loop body
LE: loop exit
PB: predicated region body
PF: predicated region fallthrough
CT: control target
= control target key end

     0   :  { %s450_s0 = inlined_call_operand.vmem [shape: bf16[8,32], index: 0, kind: input, shape index: {}]   ;;  %s451_s1 = inlined_call_operand.hbm [shape: bf16[32,128], index: 1, kind: input, shape index: {}]   ;;  %s452_s2 = inlined_call_operand.vmem [shape: f32[1,128], index: 2, kind: input, shape index: {}]   ;;  %s453_s3 = inlined_call_operand.hbm [shape: bf16[128,128], index: 3, kind: input, shape index: {}]   ;;  %s454_s4 = inlined_call_operand.vmem [shape: f32[1,128], index: 4, kind: input, shape index: {}]   ;;  %s455_s5 = inlined_call_operand.vmem [shape: f32[1,128], index: 5, kind: input, shape index: {}]   ;;  %s456_s6 = inlined_call_operand.<no memory space> [shape: f32[1,1], index: 6, kind: input, shape index: {}]   ;;  %s457_s7 = inlined_call_operand.vmem [shape: f32[8,1], index: 7, kind: output, shape index: {}]  }
   0x1   :  { %v12_v0 = vstv %s456_s6 }
   0x2   :  { %13 = vst [vmem:[#allocation2] sm:$0x1] %v12_v0 }
   0x3   :  { %14 = vsyncpa [#allocation4], 0 }
   0x4   :  { %15 = vsyncpa [#allocation6], 0  ;;  %s380_s26 = smov [#allocation3]  }
   0x5   :  { %s23_s27 = sshll.u32 %s380_s26, 4  ;;  %s24_s27 = int_to_ptr.vmem [resolvable:$true] %s23_s27 }
   0x6   :  { %s344_s28 = scalar_lea.vmem %s24_s27, 256  ;;  %p349_p1 = scmp.lt.s32.totalorder %s24_s27, %s24_s27 }
   0x7   :  { %p345_p0 = scmp.ne.s32.totalorder %s24_s27, %s344_s28  ;;  %p350_p2 = scmp.lt.s32.totalorder %s344_s28, %s344_s28 }
   0x9   :  { %p351_p3 = por %p350_p2, %p349_p1 }
   0xb   :  { %p352_p4 = pnand %p351_p3, %p345_p0 }
   0xd   :  { %355 = shalt.err (!%p352_p4)
}
   0xe   :  { %s381_s29 = smov 64   ;;  %s382_s30 = smov 4  }
   0xf   :  { %29 = dma.hbm_to_vmem [thread:$0]  %s451_s1, 256, %s24_s27, [#allocation4], %s381_s29, %s381_s29, %s382_s30  }
  0x10   :  { %s383_s6 = smov [#allocation5]  }
  0x11   :  { %s37_s10 = sshll.u32 %s383_s6, 4  ;;  %s38_s10 = int_to_ptr.vmem [resolvable:$true] %s37_s10 }
  0x12   :  { %s364_s11 = scalar_lea.vmem %s38_s10, 1024  ;;  %p369_p6 = scmp.lt.s32.totalorder %s38_s10, %s38_s10 }
  0x13   :  { %p365_p5 = scmp.ne.s32.totalorder %s38_s10, %s364_s11  ;;  %p370_p7 = scmp.lt.s32.totalorder %s364_s11, %s364_s11 }
  0x15   :  { %p371_p8 = por %p370_p7, %p369_p6 }
  0x17   :  { %p372_p9 = pnand %p371_p8, %p365_p5 }
  0x19   :  { %375 = shalt.err (!%p372_p9)
}
  0x1a   :  { %43 = dma.hbm_to_vmem [thread:$0]  %s453_s3, 1024, %s38_s10, [#allocation6], %s381_s29, %s381_s29, %s382_s30  }
  0x1b   :  { %376 = dma.done.wait [#allocation4], 256  }
  0x1c   :  { %377 = vsyncadd [#allocation4], 4294967040 }
  0x1d   :  { %378 = dma.done.wait [#allocation6], 1024  }
  0x1e   :  { %379 = vsyncadd [#allocation6], 4294966272  ;;  %v384_v1 = vmov 0.0   ;;  %vm385_vm0 = vmmov 0   ;;  %v326_v2 = vld [vmem:[#allocation3 + $0x8] sm:$0xff]   ;;  %v327_v3 = vld [vmem:[#allocation3] sm:$0xff]  }
  0x1f   :  { %292 = vmatprep.subr.bf16.mxu0 %v384_v1  ;;  %296 = vmatprep.mubr.msk.bf16.mxu0 %vm385_vm0, %v384_v1  ;;  %v328_v4 = vld [vmem:[#allocation5 + $0x38] sm:$0xff]   ;;  %vm81_vm1 = vcmask 261120   ;;  %v329_v5 = vld [vmem:[#allocation5 + $0x30] sm:$0xff]   ;;  %v330_v7 = vld [vmem:[#allocation5 + $0x28] sm:$0xff]   ;;  %vm257_vm2 = vcmask 7168  }
  0x20   :  { %300 = vmatprep.subr.bf16.mxu1 %v384_v1  ;;  %316 = vmatprep.mubr.msk.bf16.mxu1 %vm385_vm0, %v384_v1  ;;  %v57_v6 = vld [vmem:[%s450_s0] sm:$0xf]  ;;  %v331_v8 = vld [vmem:[#allocation5 + $0x20] sm:$0xff]   ;;  %v332_v9 = vld [vmem:[#allocation5 + $0x18] sm:$0xff]  }
  0x21   :  { %293 = vmatpush3.bf16.msra.mxu0 %v326_v2  ;;  %301 = vmatpush3.bf16.msra.mxu1 %v328_v4  ;;  %v333_v10 = vld [vmem:[#allocation5 + $0x10] sm:$0xff]   ;;  %v334_v11 = vld [vmem:[#allocation5 + $0x8] sm:$0xff]   ;;  %v335_v12 = vld [vmem:[#allocation5] sm:$0xff]  }
  0x22   :  { %294 = vmatprep.subr.bf16.mxu0 %v384_v1  ;;  %302 = vmatprep.subr.bf16.mxu1 %v384_v1  ;;  %v265_v13 = vld [vmem:[%s452_s2] ss:$0 sm:$0xff] }
  0x23   :  { %v269_v21 = vld [vmem:[%s454_s4] ss:$0 sm:$0xff] }
  0x24   :  { %v278_v25 = vld [vmem:[%s455_s5] ss:$0 sm:$0xff] }
  0x25   :  { %295 = vmatpush3.bf16.msra.mxu0 %v327_v3  ;;  %303 = vmatpush3.bf16.msra.mxu1 %v329_v5  ;;  %v279_v30 = vld [vmem:[#allocation2] ss:$0 sm:$0xff] }
  0x26   :  { %304 = vmatprep.subr.bf16.mxu1 %v384_v1 }
  0x28   :  { %297 = vmatmul.mubr.msk.bf16.vlgmr.msra.gmra.mxu0 %vm81_vm1, %v57_v6 }
  0x29   :  { %305 = vmatpush3.bf16.msra.mxu1 %v330_v7 }
  0x2a   :  { %306 = vmatprep.subr.bf16.mxu1 %v384_v1 }
  0x2d   :  { %307 = vmatpush3.bf16.msra.mxu1 %v331_v8 }
  0x2e   :  { %308 = vmatprep.subr.bf16.mxu1 %v384_v1 }
  0x31   :  { %309 = vmatpush3.bf16.msra.mxu1 %v332_v9 }
  0x32   :  { %310 = vmatprep.subr.bf16.mxu1 %v384_v1 }
  0x35   :  { %311 = vmatpush3.bf16.msra.mxu1 %v333_v10 }
  0x36   :  { %312 = vmatprep.subr.bf16.mxu1 %v384_v1 }
  0x39   :  { %313 = vmatpush3.bf16.msra.mxu1 %v334_v11 }
  0x3a   :  { %314 = vmatprep.subr.bf16.mxu1 %v384_v1 }
  0x3d   :  { %315 = vmatpush3.bf16.msra.mxu1 %v335_v12 }
  0xe8   :  { %v119_v14 = vpop.f32.mrf.mxu0 }
  0xe9   :  { %v120_v15 = vadd.f32 %v265_v13, %v119_v14 }
  0xea   :  { %v298_v16 = vpop.f32.mrf.mxu0 }
  0xeb   :  { %v125_v17 = vmax.f32 %v120_v15, 0.0 }
  0xec   :  { %v122_v18 = vpop.f32.mrf.mxu0 }
  0xed   :  { %v126_v19 = vpack.c.bf16 %v125_v17, %v125_v17 }
  0xee   :  { %v299_v20 = vpop.f32.mrf.mxu0 }
  0xef   :  { %317 = vmatmul.mubr.bf16.vlgmr.msra.gmra.mxu1 %v126_v19 }
 0x1af   :  { %v232_v22 = vpop.f32.mrf.mxu1 }
 0x1b0   :  { %v233_v23 = vadd.f32 %v269_v21, %v232_v22 }
 0x1b1   :  { %v318_v24 = vpop.f32.mrf.mxu1 }
 0x1b2   :  { %v238_v26 = vmax.f32 %v233_v23, 0.0 }
 0x1b3   :  { %v235_v27 = vpop.f32.mrf.mxu1 }
 0x1b4   :  { %v246_v28 = vmul.f32 %v278_v25, %v238_v26 }
 0x1b5   :  { %v319_v29 = vpop.f32.mrf.mxu1 }
 0x1b6   :  { %247 = vadd.xlane.f32.xlu0 %v246_v28 }
 0x23f   :  { %v248_v31 = vpop.xlane.xlu0 %247 }
 0x240   :  { %v256_v32 = vadd.f32 %v279_v30, %v248_v31 }
 0x242   :  { %258 = vst.msk [vmem:[%s457_s7] sm:$0xff] %vm257_vm2, %v256_v32 }
 0x243   :  { %263 = vsyncpa [#allocation4], 1 }
 0x244   :  { %264 = vsyncpa [#allocation6], 1 }

</bundles_post_ra>
